<compile_context>
chip_gen: v7x
topology: tpu7x:2x2x1
jax: 0.10.0
libtpu: 0.0.40
codegen_flags: <defaults>
</compile_context>

<pallas_src>
import functools

import jax
import jax.numpy as jnp
from jax.experimental import pallas as pl
from jax.experimental.pallas import tpu as pltpu


def _round_up(a: int, m: int) -> int:
    return (a + m - 1) // m * m


def topic_mlp_kernel(x_ref, mask_ref, cnt_ref,
                     w1_ref, b1_ref, w2_ref, b2_ref, w3_ref, b3_ref,
                     out_ref, acc_ref, *, seq_len, seq_tile, mask_tail):
    """Grid = (batch tiles, seq tiles); the seq axis is the reduction axis."""
    s = pl.program_id(1)

    @pl.when(s == 0)
    def _init():
        acc_ref[...] = jnp.zeros_like(acc_ref)

    x = x_ref[...]        # (TB, TS, H)  model dtype (bf16 or f32)
    m = mask_ref[...]     # (TB, 1, TS)  model dtype

    if mask_tail:
        # Last seq tile is partial: the DMA padding region is undefined, so zero
        # both the mask AND x (0 * NaN would still be NaN).
        start = s * seq_tile
        pos_m = jax.lax.broadcasted_iota(jnp.int32, m.shape, 2) + start
        m = jnp.where(pos_m < seq_len, m, jnp.zeros((), m.dtype))
        pos_x = jax.lax.broadcasted_iota(jnp.int32, (1, x.shape[1], 1), 1) + start
        x = jnp.where(pos_x < seq_len, x, jnp.zeros((), x.dtype))

    # Masked-sum partial reduction on the MXU: (TB,1,TS) @ (TB,TS,H) -> (TB,1,H),
    # accumulated in f32 (bf16 x bf16 products are exact in f32).
    acc_ref[...] += jnp.einsum('bqs,bsh->bqh', m, x,
                               preferred_element_type=jnp.float32)

    @pl.when(s == pl.num_programs(1) - 1)
    def _finalize():
        # Masked mean pooling; counts precomputed (and clamped >= 1) in wrapper.
        h = acc_ref[...][:, 0, :] * (1.0 / cnt_ref[...])             # (TB, H)

        # Head: ReLU then Linear, three times (weights stored (in, out),
        # lane-padded to multiples of 128 by the wrapper).
        for w_ref, b_ref in ((w1_ref, b1_ref), (w2_ref, b2_ref), (w3_ref, b3_ref)):
            h = jnp.maximum(h, 0.0)
            h = jnp.dot(h, w_ref[...], preferred_element_type=jnp.float32)
            h = h + b_ref[...]

        # Softmax over the lane-padded output dim.  Padded lanes carry a -1e30
        # bias so exp() underflows to 0.  Exact divide -> rows sum to 1.
        zmax = jnp.max(h, axis=1, keepdims=True)
        e = jnp.exp(h - zmax)
        out_ref[...] = (e / jnp.sum(e, axis=1, keepdims=True)).astype(out_ref.dtype)


@functools.partial(jax.jit, static_argnames=("tb", "ts", "x_vmem_budget"))
def topic_transformer_mlp_head(x, mask, params, *, tb=None, ts=None,
                               x_vmem_budget=24 << 20):
    """x: (B, S, H) last_hidden_state (bf16 or f32); mask: (B, S) attention mask."""
    B, S, H = x.shape
    D1 = params["w1"].shape[1]
    D2 = params["w2"].shape[1]
    O = params["w3"].shape[1]
    f32 = jnp.float32
    x_item = jnp.dtype(x.dtype).itemsize

    def fits(tb_, ts_):   # double-buffered x tile within the streaming budget
        return 2 * tb_ * ts_ * H * x_item <= x_vmem_budget

    # --- seq tile -----------------------------------------------------------
    # The mask block's last (lane) dim is TS, so TS must be a multiple of 128
    # unless it spans all of S.
    if ts is not None:
        TS = S if int(ts) >= S else max(128, (int(ts) // 128) * 128)
    else:
        TS = S
        if S > 512 or not fits(8, TS):
            TS = 512
        while TS > 128 and not fits(8, TS):
            TS -= 128

    # --- batch tile -----------------------------------------------------------
    if tb is not None:
        TB = _round_up(int(tb), 8)
    else:
        if B <= 8:
            TB = 8
        else:
            TB = min(128, _round_up(-(-B // 2), 8))   # >=2 blocks for v7x dual-TC
        while TB > 8 and not fits(TB, TS):
            TB -= 8

    nb = pl.cdiv(B, TB)
    ns = pl.cdiv(S, TS)
    mask_tail = (S % TS) != 0

    D1P, D2P, OP = (_round_up(d, 128) for d in (D1, D2, O))

    # --- tiny wrapper-side inputs (NO padded HBM copy of x) ------------------
    mask_f = mask.astype(f32)
    cnt = jnp.maximum(jnp.sum(mask_f, axis=1, keepdims=True), 1.0)      # (B, 1)
    mask3 = mask_f.astype(x.dtype).reshape(B, 1, S)                     # (B, 1, S)

    def pad_w(w, rows, cols):
        r, c = w.shape
        return jnp.zeros((rows, cols), f32).at[:r, :c].set(w.astype(f32))

    def pad_b(b, cols, fill=0.0):
        b = jnp.asarray(b, f32).reshape(1, -1)
        return jnp.full((1, cols), fill, f32).at[:, :b.shape[1]].set(b)

    w1 = pad_w(params["w1"], H, D1P);    b1 = pad_b(params["b1"], D1P)
    w2 = pad_w(params["w2"], D1P, D2P);  b2 = pad_b(params["b2"], D2P)
    w3 = pad_w(params["w3"], D2P, OP);   b3 = pad_b(params["b3"], OP, fill=-1e30)

    # --- explicit VMEM limit from actual tile usage --------------------------
    vmem_bytes = (
        2 * TB * TS * H * x_item                                  # x stream (2 bufs)
        + 2 * TB * 8 * TS * x_item                                # mask tiles
        + 2 * TB * 128 * 4                                        # counts
        + 2 * 4 * (H * D1P + D1P * D2P + D2P * OP + D1P + D2P + OP + 3 * 128)
        + 2 * TB * OP * 4                                         # output tile
        + TB * 8 * H * 4                                          # f32 accumulator
    )
    vmem_limit = int(min(max(vmem_bytes + (4 << 20), 16 << 20), 100 << 20))

    kernel = functools.partial(topic_mlp_kernel, seq_len=S, seq_tile=TS,
                               mask_tail=mask_tail)
    const = lambda b, s: (0, 0)                 # weights resident across grid

    out = pl.pallas_call(
        kernel,
        out_shape=jax.ShapeDtypeStruct((B, OP), f32),
        grid_spec=pltpu.PrefetchScalarGridSpec(
            num_scalar_prefetch=0,
            grid=(nb, ns),
            in_specs=[
                pl.BlockSpec((TB, TS, H), lambda b, s: (b, s, 0)),    # x (streamed)
                pl.BlockSpec((TB, 1, TS), lambda b, s: (b, 0, s)),    # mask
                pl.BlockSpec((TB, 1), lambda b, s: (b, 0)),           # token counts
                pl.BlockSpec((H, D1P), const),   pl.BlockSpec((1, D1P), const),
                pl.BlockSpec((D1P, D2P), const), pl.BlockSpec((1, D2P), const),
                pl.BlockSpec((D2P, OP), const),  pl.BlockSpec((1, OP), const),
            ],
            out_specs=pl.BlockSpec((TB, OP), lambda b, s: (b, 0)),
            scratch_shapes=[pltpu.VMEM((TB, 1, H), jnp.float32)],     # pooled sum
        ),
        compiler_params=pltpu.CompilerParams(
            dimension_semantics=("parallel", "arbitrary"),
            vmem_limit_bytes=vmem_limit,
        ),
    )(x, mask3, cnt, w1, b1, w2, b2, w3, b3)

    return out[:, :O]


def _init_linear(key, fan_in, fan_out):
    """Deterministic PyTorch-nn.Linear-style uniform init, stored as (in, out)."""
    kw, kb = jax.random.split(key)
    bound = 1.0 / jnp.sqrt(float(fan_in))
    w = jax.random.uniform(kw, (fan_in, fan_out), jnp.float32, -bound, bound)
    b = jax.random.uniform(kb, (1, fan_out), jnp.float32, -bound, bound)
    return w, b


def _reference(x, mask, params):
    """Pure-JAX reference of the same forward (matches the PyTorch module)."""
    xf = x.astype(jnp.float32)
    pm = mask[:, :, None].astype(jnp.float32)
    pooled = (xf * pm).sum(axis=1) / mask.astype(jnp.float32).sum(axis=1, keepdims=True)
    h = pooled
    for w, b in ((params["w1"], params["b1"]),
                 (params["w2"], params["b2"]),
                 (params["w3"], params["b3"])):
        h = jnp.maximum(h, 0.0)
        h = h @ w + b
    return jax.nn.softmax(h, axis=1)


if __name__ == "__main__":
    # Small shapes consistent with the module: hidden H=32, head dims [64, 32],
    # output_dim=16.  Two configs: (A) tiny single-tile path, (B) longer seq with
    # a forced 128-row seq tile so multi-tile accumulation, the partial-tail
    # masking, and >1 batch block are all exercised.
    H, D1, D2, O = 32, 64, 32, 16
    key = jax.random.PRNGKey(0)
    k1, k2, k3, kxa, kxb = jax.random.split(key, 5)

    w1, b1 = _init_linear(k1, H, D1)
    w2, b2 = _init_linear(k2, D1, D2)
    w3, b3 = _init_linear(k3, D2, O)
    params = {"w1": w1, "b1": b1, "w2": w2, "b2": b2, "w3": w3, "b3": b3}

    def run_case(kx, B, S, **kw):
        # Backbone output in bf16 (halves HBM traffic for the dominant stream).
        x = jax.random.normal(kx, (B, S, H), jnp.float32).astype(jnp.bfloat16)
        lengths = (jnp.arange(B) % (S - 2)) + 2            # 2..S-1 valid tokens
        mask = (jnp.arange(S)[None, :] < lengths[:, None]).astype(jnp.float32)

        out = jax.block_until_ready(topic_transformer_mlp_head(x, mask, params, **kw))
        ref = _reference(x, mask, params)

        assert out.shape == (B, O), out.shape
        err = float(jnp.max(jnp.abs(out - ref)))
        assert err < 2e-3, f"max abs err {err}"
        assert bool(jnp.allclose(out.sum(axis=1), jnp.ones((B,)), atol=1e-3))

    run_case(kxa, B=4, S=8)               # single seq tile (TS == S)
    run_case(kxb, B=9, S=160, ts=128)     # 2 batch x 2 seq tiles, partial tail

    # TODO(synk): tokenizer + pretrained transformer backbone (AutoModel) are not
    # translatable to a Pallas kernel; the kernel starts from last_hidden_state.
    print("KERNEL_OK")
</pallas_src>

<mosaic_0001>
module attributes {stable_mosaic.version = 11 : i64} {
  func.func @topic_mlp_kernel(%arg0: i32, %arg1: i32, %arg2: memref<8x8x32xbf16, #tpu.memory_space<vmem>>, %arg3: memref<8x1x8xbf16, #tpu.memory_space<vmem>>, %arg4: memref<8x1xf32, #tpu.memory_space<vmem>>, %arg5: memref<32x128xf32, #tpu.memory_space<vmem>>, %arg6: memref<1x128xf32, #tpu.memory_space<vmem>>, %arg7: memref<128x128xf32, #tpu.memory_space<vmem>>, %arg8: memref<1x128xf32, #tpu.memory_space<vmem>>, %arg9: memref<128x128xf32, #tpu.memory_space<vmem>>, %arg10: memref<1x128xf32, #tpu.memory_space<vmem>>, %arg11: memref<8x128xf32, #tpu.memory_space<vmem>>, %arg12: memref<8x1x32xf32, #tpu.memory_space<vmem>>) attributes {dimension_semantics = [#tpu.dimension_semantics<parallel>, #tpu.dimension_semantics<arbitrary>], iteration_bounds = array<i64: 1, 1>, scalar_prefetch = 0 : i64, scratch_operands = 1 : i64, tpu.core_type = #tpu.core_type<tc>, window_params = [{transform_indices = @transform_0, window_bounds = array<i64: 8, 8, 32>}, {transform_indices = @transform_1, window_bounds = array<i64: 8, 1, 8>}, {transform_indices = @transform_2, window_bounds = array<i64: 8, 1>}, {pipeline_mode = #tpu.pipeline_mode<synchronous>, transform_indices = @transform_3, window_bounds = array<i64: 32, 128>}, {pipeline_mode = #tpu.pipeline_mode<synchronous>, transform_indices = @transform_4, window_bounds = array<i64: 1, 128>}, {pipeline_mode = #tpu.pipeline_mode<synchronous>, transform_indices = @transform_5, window_bounds = array<i64: 128, 128>}, {pipeline_mode = #tpu.pipeline_mode<synchronous>, transform_indices = @transform_6, window_bounds = array<i64: 1, 128>}, {pipeline_mode = #tpu.pipeline_mode<synchronous>, transform_indices = @transform_7, window_bounds = array<i64: 128, 128>}, {pipeline_mode = #tpu.pipeline_mode<synchronous>, transform_indices = @transform_8, window_bounds = array<i64: 1, 128>}, {transform_indices = @transform_9, window_bounds = array<i64: 8, 128>}]} {
    %c0_i32 = arith.constant 0 : i32
    %0 = arith.cmpi eq, %arg1, %c0_i32 : i32
    %1 = arith.extui %0 : i1 to i32
    %c0_i32_0 = arith.constant 0 : i32
    %2 = arith.cmpi ne, %1, %c0_i32_0 : i32
    scf.if %2 {
      %cst_14 = arith.constant 0.000000e+00 : f32
      %12 = vector.broadcast %cst_14 : f32 to vector<8x1x32xf32>
      %c0_15 = arith.constant 0 : index
      %c0_16 = arith.constant 0 : index
      %c0_17 = arith.constant 0 : index
      %13 = vector.load %arg12[%c0_15, %c0_16, %c0_17] : memref<8x1x32xf32, #tpu.memory_space<vmem>>, vector<8x1x32xf32>
      tpu.vector_store %arg12[%c0_15, %c0_16, %c0_17], %12 {strides = array<i32>} : memref<8x1x32xf32, #tpu.memory_space<vmem>>, vector<8x1x32xf32>,
    } else {
    }
    %c0 = arith.constant 0 : index
    %c0_1 = arith.constant 0 : index
    %c0_2 = arith.constant 0 : index
    %3 = vector.load %arg2[%c0, %c0_1, %c0_2] : memref<8x8x32xbf16, #tpu.memory_space<vmem>>, vector<8x8x32xbf16>
    %c0_3 = arith.constant 0 : index
    %c0_4 = arith.constant 0 : index
    %c0_5 = arith.constant 0 : index
    %4 = vector.load %arg3[%c0_3, %c0_4, %c0_5] : memref<8x1x8xbf16, #tpu.memory_space<vmem>>, vector<8x1x8xbf16>
    %c0_6 = arith.constant 0 : index
    %c0_7 = arith.constant 0 : index
    %c0_8 = arith.constant 0 : index
    %5 = vector.load %arg12[%c0_6, %c0_7, %c0_8] : memref<8x1x32xf32, #tpu.memory_space<vmem>>, vector<8x1x32xf32>
    "tpu.trace_start"() <{level = 10 : i32, message = "bqs,bsh->bqh"}> : () -> ()
    %cst = arith.constant dense<0.000000e+00> : vector<8x1x32xf32>
    %6 = tpu.matmul %4, %3, %cst {dimension_numbers = #tpu.dot_dimension_numbers<[2], [1], [1], [2], [0, 0, 0, 1, 1, 2], [0], [0]>} : vector<8x1x8xbf16>, vector<8x8x32xbf16>, vector<8x1x32xf32> -> vector<8x1x32xf32>
    "tpu.trace_stop"() : () -> ()
    %7 = arith.addf %5, %6 : vector<8x1x32xf32>
    %c0_9 = arith.constant 0 : index
    %c0_10 = arith.constant 0 : index
    %c0_11 = arith.constant 0 : index
    %8 = vector.load %arg12[%c0_9, %c0_10, %c0_11] : memref<8x1x32xf32, #tpu.memory_space<vmem>>, vector<8x1x32xf32>
    tpu.vector_store %arg12[%c0_9, %c0_10, %c0_11], %7 {strides = array<i32>} : memref<8x1x32xf32, #tpu.memory_space<vmem>>, vector<8x1x32xf32>,
    %c0_i32_12 = arith.constant 0 : i32
    %9 = arith.cmpi eq, %arg1, %c0_i32_12 : i32
    %10 = arith.extui %9 : i1 to i32
    %c0_i32_13 = arith.constant 0 : i32
    %11 = arith.cmpi ne, %10, %c0_i32_13 : i32
    scf.if %11 {
      %c0_14 = arith.constant 0 : index
      %c0_15 = arith.constant 0 : index
      %c0_16 = arith.constant 0 : index
      %12 = vector.load %arg12[%c0_14, %c0_15, %c0_16] : memref<8x1x32xf32, #tpu.memory_space<vmem>>, vector<8x1x32xf32>
      %13 = vector.shape_cast %12 : vector<8x1x32xf32> to vector<8x32xf32>
      %c0_17 = arith.constant 0 : index
      %c0_18 = arith.constant 0 : index
      %14 = vector.load %arg4[%c0_17, %c0_18] : memref<8x1xf32, #tpu.memory_space<vmem>>, vector<8x1xf32>
      %cst_19 = arith.constant 1.000000e+00 : f32
      %15 = vector.broadcast %cst_19 : f32 to vector<8x1xf32>
      %16 = arith.divf %15, %14 : vector<8x1xf32>
      %17 = vector.broadcast %16 : vector<8x1xf32> to vector<8x32xf32>
      %18 = arith.mulf %13, %17 : vector<8x32xf32>
      %cst_20 = arith.constant 0.000000e+00 : f32
      %19 = vector.broadcast %cst_20 : f32 to vector<8x32xf32>
      %20 = arith.maximumf %18, %19 : vector<8x32xf32>
      %c0_21 = arith.constant 0 : index
      %c0_22 = arith.constant 0 : index
      %21 = vector.load %arg5[%c0_21, %c0_22] : memref<32x128xf32, #tpu.memory_space<vmem>>, vector<32x128xf32>
      %cst_23 = arith.constant dense<0.000000e+00> : vector<8x128xf32>
      %22 = tpu.matmul %20, %21, %cst_23 {dimension_numbers = #tpu.dot_dimension_numbers<[1], [0], [0], [1], [0, 0, 1, 1], [], []>} : vector<8x32xf32>, vector<32x128xf32>, vector<8x128xf32> -> vector<8x128xf32>
      %c0_24 = arith.constant 0 : index
      %c0_25 = arith.constant 0 : index
      %23 = vector.load %arg6[%c0_24, %c0_25] : memref<1x128xf32, #tpu.memory_space<vmem>>, vector<1x128xf32>
      %24 = vector.broadcast %23 : vector<1x128xf32> to vector<8x128xf32>
      %25 = arith.addf %22, %24 : vector<8x128xf32>
      %cst_26 = arith.constant 0.000000e+00 : f32
      %26 = vector.broadcast %cst_26 : f32 to vector<8x128xf32>
      %27 = arith.maximumf %25, %26 : vector<8x128xf32>
      %c0_27 = arith.constant 0 : index
      %c0_28 = arith.constant 0 : index
      %28 = vector.load %arg7[%c0_27, %c0_28] : memref<128x128xf32, #tpu.memory_space<vmem>>, vector<128x128xf32>
      %cst_29 = arith.constant dense<0.000000e+00> : vector<8x128xf32>
      %29 = tpu.matmul %27, %28, %cst_29 {dimension_numbers = #tpu.dot_dimension_numbers<[1], [0], [0], [1], [0, 0, 1, 1], [], []>} : vector<8x128xf32>, vector<128x128xf32>, vector<8x128xf32> -> vector<8x128xf32>
      %c0_30 = arith.constant 0 : index
      %c0_31 = arith.constant 0 : index
      %30 = vector.load %arg8[%c0_30, %c0_31] : memref<1x128xf32, #tpu.memory_space<vmem>>, vector<1x128xf32>
      %31 = vector.broadcast %30 : vector<1x128xf32> to vector<8x128xf32>
      %32 = arith.addf %29, %31 : vector<8x128xf32>
      %cst_32 = arith.constant 0.000000e+00 : f32
      %33 = vector.broadcast %cst_32 : f32 to vector<8x128xf32>
      %34 = arith.maximumf %32, %33 : vector<8x128xf32>
      %c0_33 = arith.constant 0 : index
      %c0_34 = arith.constant 0 : index
      %35 = vector.load %arg9[%c0_33, %c0_34] : memref<128x128xf32, #tpu.memory_space<vmem>>, vector<128x128xf32>
      %cst_35 = arith.constant dense<0.000000e+00> : vector<8x128xf32>
      %36 = tpu.matmul %34, %35, %cst_35 {dimension_numbers = #tpu.dot_dimension_numbers<[1], [0], [0], [1], [0, 0, 1, 1], [], []>} : vector<8x128xf32>, vector<128x128xf32>, vector<8x128xf32> -> vector<8x128xf32>
      %c0_36 = arith.constant 0 : index
      %c0_37 = arith.constant 0 : index
      %37 = vector.load %arg10[%c0_36, %c0_37] : memref<1x128xf32, #tpu.memory_space<vmem>>, vector<1x128xf32>
      %38 = vector.broadcast %37 : vector<1x128xf32> to vector<8x128xf32>
      %39 = arith.addf %36, %38 : vector<8x128xf32>
      %cst_38 = arith.constant dense<0xFF800000> : vector<8xf32>
      %40 = vector.multi_reduction <maximumf>, %39, %cst_38 [1] : vector<8x128xf32> to vector<8xf32>
      %41 = vector.shape_cast %40 : vector<8xf32> to vector<8x1xf32>
      %42 = vector.broadcast %41 : vector<8x1xf32> to vector<8x128xf32>
      %43 = arith.subf %39, %42 : vector<8x128xf32>
      %44 = math.exp %43 : vector<8x128xf32>
      %cst_39 = arith.constant dense<0.000000e+00> : vector<8xf32>
      %45 = vector.multi_reduction <add>, %44, %cst_39 [1] : vector<8x128xf32> to vector<8xf32>
      %46 = vector.shape_cast %45 : vector<8xf32> to vector<8x1xf32>
      %47 = vector.broadcast %46 : vector<8x1xf32> to vector<8x128xf32>
      %48 = arith.divf %44, %47 : vector<8x128xf32>
      %c0_40 = arith.constant 0 : index
      %c0_41 = arith.constant 0 : index
      %49 = vector.load %arg11[%c0_40, %c0_41] : memref<8x128xf32, #tpu.memory_space<vmem>>, vector<8x128xf32>
      tpu.vector_store %arg11[%c0_40, %c0_41], %48 {strides = array<i32>} : memref<8x128xf32, #tpu.memory_space<vmem>>, vector<8x128xf32>,
    } else {
    }
    return
  }
  func.func @transform_0(%arg0: i32, %arg1: i32) -> (i32, i32, i32) {
    %c0_i32 = arith.constant 0 : i32
    %c0_i32_0 = arith.constant 0 : i32
    return %arg0, %arg1, %c0_i32 : i32, i32, i32
  }
  func.func @transform_1(%arg0: i32, %arg1: i32) -> (i32, i32, i32) {
    %c0_i32 = arith.constant 0 : i32
    %c0_i32_0 = arith.constant 0 : i32
    return %arg0, %c0_i32, %arg1 : i32, i32, i32
  }
  func.func @transform_2(%arg0: i32, %arg1: i32) -> (i32, i32) {
    %c0_i32 = arith.constant 0 : i32
    %c0_i32_0 = arith.constant 0 : i32
    return %arg0, %c0_i32 : i32, i32
  }
  func.func @transform_3(%arg0: i32, %arg1: i32) -> (i32, i32) {
    %c0_i32 = arith.constant 0 : i32
    %c0_i32_0 = arith.constant 0 : i32
    %c0_i32_1 = arith.constant 0 : i32
    return %c0_i32, %c0_i32_0 : i32, i32
  }
  func.func @transform_4(%arg0: i32, %arg1: i32) -> (i32, i32) {
    %c0_i32 = arith.constant 0 : i32
    %c0_i32_0 = arith.constant 0 : i32
    %c0_i32_1 = arith.constant 0 : i32
    return %c0_i32, %c0_i32_0 : i32, i32
  }
  func.func @transform_5(%arg0: i32, %arg1: i32) -> (i32, i32) {
    %c0_i32 = arith.constant 0 : i32
    %c0_i32_0 = arith.constant 0 : i32
    %c0_i32_1 = arith.constant 0 : i32
    return %c0_i32, %c0_i32_0 : i32, i32
  }
  func.func @transform_6(%arg0: i32, %arg1: i32) -> (i32, i32) {
    %c0_i32 = arith.constant 0 : i32
    %c0_i32_0 = arith.constant 0 : i32
    %c0_i32_1 = arith.constant 0 : i32
    return %c0_i32, %c0_i32_0 : i32, i32
  }
  func.func @transform_7(%arg0: i32, %arg1: i32) -> (i32, i32) {
    %c0_i32 = arith.constant 0 : i32
    %c0_i32_0 = arith.constant 0 : i32
    %c0_i32_1 = arith.constant 0 : i32
    return %c0_i32, %c0_i32_0 : i32, i32
  }
  func.func @transform_8(%arg0: i32, %arg1: i32) -> (i32, i32) {
    %c0_i32 = arith.constant 0 : i32
    %c0_i32_0 = arith.constant 0 : i32
    %c0_i32_1 = arith.constant 0 : i32
    return %c0_i32, %c0_i32_0 : i32, i32
  }
  func.func @transform_9(%arg0: i32, %arg1: i32) -> (i32, i32) {
    %c0_i32 = arith.constant 0 : i32
    %c0_i32_0 = arith.constant 0 : i32
    return %arg0, %c0_i32 : i32, i32
  }
}

</mosaic_0001>

<bundles_post_ra>
// kernel: topic_transformer_mlp_head.1
= control target key start
LH: loop header
LB: loop body
LE: loop exit
PB: predicated region body
PF: predicated region fallthrough
CT: control target
= control target key end

     0   :  { %14 = vsyncpa [#allocation4], 0  ;;  %vm75_vm0 = vcmask 1043456   ;;  %v1176_v1 = vmov 0.0   ;;  %vm1177_vm1 = vmmov 0   ;;  %vm71_vm2 = vcmask 64512   ;;  %s1513_s0 = inlined_call_operand.vmem [shape: bf16[4,8,32], index: 0, kind: input, shape index: {}]   ;;  %s1514_s1 = inlined_call_operand.vmem [shape: bf16[4,1,8], index: 1, kind: input, shape index: {}]   ;;  %s1515_s2 = inlined_call_operand.vmem [shape: f32[4,1], index: 2, kind: input, shape index: {}]   ;;  %s1516_s3 = inlined_call_operand.vmem [shape: f32[32,128], index: 3, kind: input, shape index: {}]   ;;  %s1517_s4 = inlined_call_operand.vmem [shape: f32[1,128], index: 4, kind: input, shape index: {}]   ;;  %s1518_s5 = inlined_call_operand.vmem [shape: f32[128,128], index: 5, kind: input, shape index: {}]   ;;  %s1519_s6 = inlined_call_operand.vmem [shape: f32[1,128], index: 6, kind: input, shape index: {}]   ;;  %s1520_s7 = inlined_call_operand.vmem [shape: f32[128,128], index: 7, kind: input, shape index: {}]   ;;  %s1521_s8 = inlined_call_operand.vmem [shape: f32[1,128], index: 8, kind: input, shape index: {}]   ;;  %s1522_s9 = inlined_call_operand.hbm [shape: f32[4,128], index: 9, kind: output, shape index: {}]  }
   0x1   :  { %v47_v0 = vld [vmem:[%s1513_s0] sm:$0xf]  ;;  %954 = vmatprep.subr.bf16.mxu0 %v1176_v1  ;;  %960 = vmatprep.subr.bf16.mxu1 %v1176_v1  ;;  %v48_v3 = vld [vmem:[%s1513_s0 + $0x4] sm:$0xf]  ;;  %v49_v6 = vld [vmem:[%s1513_s0 + $0x8] sm:$0xf] }
   0x2   :  { %v77_v2 = vsel %vm75_vm0, %v47_v0, 0  ;;  %v123_v4 = vsel %vm75_vm0, %v48_v3, 0  ;;  %956 = vmatprep.mubr.msk.bf16.mxu0 %vm1177_vm1, %v1176_v1  ;;  %v55_v5 = vld [vmem:[%s1514_s1] sm:$0x1]  ;;  %962 = vmatprep.mubr.msk.bf16.mxu1 %vm1177_vm1, %v1176_v1  ;;  %v56_v7 = vld [vmem:[%s1514_s1 + $0x1] sm:$0x1] }
   0x3   :  { %955 = vmatpush3.bf16.msra.mxu0 %v77_v2  ;;  %961 = vmatpush3.bf16.msra.mxu1 %v123_v4  ;;  %v169_v8 = vsel %vm75_vm0, %v49_v6, 0  ;;  %v50_v9 = vld [vmem:[%s1513_s0 + $0xc] sm:$0xf]  ;;  %v469_v11 = vld [vmem:[%s1515_s2] sm:$0xff]  ;;  %v1178_v12 = vmov 0   ;;  %vm38_vm3 = vcmask 253952  }
   0x4   :  { %966 = vmatprep.subr.bf16.mxu0 %v1176_v1  ;;  %972 = vmatprep.subr.bf16.mxu1 %v1176_v1  ;;  %v215_v10 = vsel %vm75_vm0, %v50_v9, 0  ;;  %1146 = vrcp.f32 %v469_v11  ;;  %39 = vst.msk [vmem:[#allocation2] sm:$0x1] %vm38_vm3, %v1176_v1  ;;  %40 = vst.msk [vmem:[#allocation2 + $0x1] sm:$0x1] %vm38_vm3, %v1176_v1  ;;  %v532_v28 = vld [vmem:[%s1516_s3] sm:$0xff] }
   0x5   :  { %1145 = vset.pattern.permute.xlu0 %v1178_v12  ;;  %41 = vst.msk [vmem:[#allocation2 + $0x2] sm:$0x1] %vm38_vm3, %v1176_v1  ;;  %42 = vst.msk [vmem:[#allocation2 + $0x3] sm:$0x1] %vm38_vm3, %v1176_v1  ;;  %v51_v13 = vld [vmem:[%s1513_s0 + $0x10] sm:$0xf] }
   0x6   :  { %957 = vmatmul.mubr.msk.bf16.vlgmr.msra.gmra.mrb[0].mxu0 %vm71_vm2, %v55_v5  ;;  %963 = vmatmul.mubr.msk.bf16.vlgmr.msra.gmra.mrb[0].mxu1 %vm71_vm2, %v56_v7  ;;  %43 = vst.msk [vmem:[#allocation2 + $0x4] sm:$0x1] %vm38_vm3, %v1176_v1  ;;  %44 = vst.msk [vmem:[#allocation2 + $0x5] sm:$0x1] %vm38_vm3, %v1176_v1  ;;  %v52_v14 = vld [vmem:[%s1513_s0 + $0x14] sm:$0xf] }
   0x7   :  { %967 = vmatpush3.bf16.msra.mxu0 %v169_v8  ;;  %45 = vst.msk [vmem:[#allocation2 + $0x6] sm:$0x1] %vm38_vm3, %v1176_v1  ;;  %46 = vst.msk [vmem:[#allocation2 + $0x7] sm:$0x1] %vm38_vm3, %v1176_v1  ;;  %973 = vmatpush3.bf16.msra.mxu1 %v215_v10  ;;  %v57_v15 = vld [vmem:[%s1514_s1 + $0x2] sm:$0x1] }
   0x8   :  { %968 = vmatprep.mubr.msk.bf16.mxu0 %vm1177_vm1, %v1176_v1  ;;  %974 = vmatprep.mubr.msk.bf16.mxu1 %vm1177_vm1, %v1176_v1  ;;  %v58_v16 = vld [vmem:[%s1514_s1 + $0x3] sm:$0x1]  ;;  %v261_v17 = vsel %vm75_vm0, %v51_v13, 0  ;;  %v307_v18 = vsel %vm75_vm0, %v52_v14, 0  ;;  %v53_v20 = vld [vmem:[%s1513_s0 + $0x18] sm:$0xf] }
   0x9   :  { %978 = vmatprep.subr.bf16.mxu0 %v1176_v1  ;;  %984 = vmatprep.subr.bf16.mxu1 %v1176_v1  ;;  %v54_v21 = vld [vmem:[%s1513_s0 + $0x1c] sm:$0xf]  ;;  %v59_v22 = vld [vmem:[%s1514_s1 + $0x4] sm:$0x1]  ;;  %v60_v23 = vld [vmem:[%s1514_s1 + $0x5] sm:$0x1] }
   0xa   :  { %v353_v24 = vsel %vm75_vm0, %v53_v20, 0  ;;  %v399_v25 = vsel %vm75_vm0, %v54_v21, 0  ;;  %v61_v26 = vld [vmem:[%s1514_s1 + $0x6] sm:$0x1]  ;;  %v62_v27 = vld [vmem:[%s1514_s1 + $0x7] sm:$0x1] }
   0xb   :  { %v533_v29 = vld [vmem:[%s1516_s3 + $0x8] sm:$0xff]  ;;  %v534_v30 = vld [vmem:[%s1516_s3 + $0x10] sm:$0xff]  ;;  %v1179_v31 = vmov 0.0|0.0   ;;  %v535_v33 = vld [vmem:[%s1516_s3 + $0x18] sm:$0xff]  ;;  %vm600_vm4 = vcmask 261120  }
   0xc   :  { %v1084_v32 = vpack.c.bf16 %v533_v29, %v532_v28  ;;  %v1087_v34 = vpack.c.bf16 %v535_v33, %v534_v30  ;;  %v674_v35 = vld [vmem:[%s1518_s5] sm:$0xff]  ;;  %v675_v36 = vld [vmem:[%s1518_s5 + $0x8] sm:$0xff]  ;;  %v676_v37 = vld [vmem:[%s1518_s5 + $0x10] sm:$0xff] }
   0xd   :  { %v1090_v38 = vpack.c.bf16 %v675_v36, %v674_v35  ;;  %v677_v39 = vld [vmem:[%s1518_s5 + $0x18] sm:$0xff]  ;;  %v678_v41 = vld [vmem:[%s1518_s5 + $0x20] sm:$0xff]  ;;  %v679_v42 = vld [vmem:[%s1518_s5 + $0x28] sm:$0xff] }
   0xe   :  { %969 = vmatmul.mubr.msk.bf16.vlgmr.msra.gmra.mrb[4].mxu0 %vm71_vm2, %v57_v15  ;;  %975 = vmatmul.mubr.msk.bf16.vlgmr.msra.gmra.mrb[4].mxu1 %vm71_vm2, %v58_v16  ;;  %v1147_v19 = vpop.eup %1146  ;;  %v1093_v40 = vpack.c.bf16 %v677_v39, %v676_v37  ;;  %v1096_v43 = vpack.c.bf16 %v679_v42, %v678_v41  ;;  %v680_v44 = vld [vmem:[%s1518_s5 + $0x30] sm:$0xff]  ;;  %v681_v45 = vld [vmem:[%s1518_s5 + $0x38] sm:$0xff]  ;;  %v682_v47 = vld [vmem:[%s1518_s5 + $0x40] sm:$0xff]  ;;  %v476_v16 = vlaneseq }
   0xf   :  { %979 = vmatpush3.bf16.msra.mxu0 %v261_v17  ;;  %985 = vmatpush3.bf16.msra.mxu1 %v307_v18  ;;  %v1099_v46 = vpack.c.bf16 %v681_v45, %v680_v44  ;;  %v683_v48 = vld [vmem:[%s1518_s5 + $0x48] sm:$0xff]  ;;  %v684_v50 = vld [vmem:[%s1518_s5 + $0x50] sm:$0xff]  ;;  %v685_v51 = vld [vmem:[%s1518_s5 + $0x58] sm:$0xff] }
  0x10   :  { %980 = vmatprep.mubr.msk.bf16.mxu0 %vm1177_vm1, %v1176_v1  ;;  %986 = vmatprep.mubr.msk.bf16.mxu1 %vm1177_vm1, %v1176_v1  ;;  %v1102_v49 = vpack.c.bf16 %v683_v48, %v682_v47  ;;  %v1105_v52 = vpack.c.bf16 %v685_v51, %v684_v50  ;;  %v686_v53 = vld [vmem:[%s1518_s5 + $0x60] sm:$0xff]  ;;  %v687_v54 = vld [vmem:[%s1518_s5 + $0x68] sm:$0xff]  ;;  %v1414_v20 = vshrl.u32 %v476_v16, 7 }
  0x11   :  { %990 = vmatprep.subr.bf16.mxu0 %v1176_v1  ;;  %996 = vmatprep.subr.bf16.mxu1 %v1176_v1  ;;  %v1108_v55 = vpack.c.bf16 %v687_v54, %v686_v53  ;;  %v63_v56 = vld [vmem:[#allocation2] sm:$0x1]  ;;  %v64_v57 = vld [vmem:[#allocation2 + $0x1] sm:$0x1]  ;;  %v65_v5 = vld [vmem:[#allocation2 + $0x2] sm:$0x1] }
  0x12   :  { %474 = vperm.xlu0 %1145, %v1147_v19   ;;  %v66_v6 = vld [vmem:[#allocation2 + $0x3] sm:$0x1]  ;;  %v67_v18 = vld [vmem:[#allocation2 + $0x4] sm:$0x1]  ;;  %v68_v19 = vld [vmem:[#allocation2 + $0x5] sm:$0x1] }
  0x13   :  { %v478_v33 = vsub.s32 0, %v1414_v20  ;;  %v494_v36 = vsub.s32 4, %v1414_v20  ;;  %v69_v41 = vld [vmem:[#allocation2 + $0x6] sm:$0x1]  ;;  %v70_v44 = vld [vmem:[#allocation2 + $0x7] sm:$0x1] }
  0x14   :  { %v502_v45 = vsub.s32 6, %v1414_v20 }
  0x16   :  { %981 = vmatmul.mubr.msk.bf16.vlgmr.msra.gmra.mrb[8].mxu0 %vm71_vm2, %v59_v22  ;;  %987 = vmatmul.mubr.msk.bf16.vlgmr.msra.gmra.mrb[8].mxu1 %vm71_vm2, %v60_v23 }
  0x17   :  { %991 = vmatpush3.bf16.msra.mxu0 %v353_v24  ;;  %997 = vmatpush3.bf16.msra.mxu1 %v399_v25  ;;  %v486_v25 = vsub.s32 2, %v1414_v20 }
  0x18   :  { %992 = vmatprep.mubr.msk.bf16.mxu0 %vm1177_vm1, %v1176_v1  ;;  %998 = vmatprep.mubr.msk.bf16.mxu1 %vm1177_vm1, %v1176_v1 }
  0x19   :  { %1083 = vmatprep.subr.bf16.mxu0 %v1179_v31  ;;  %1089 = vmatprep.subr.bf16.mxu1 %v1179_v31 }
  0x1e   :  { %993 = vmatmul.mubr.msk.bf16.vlgmr.msra.gmra.mrb[12].mxu0 %vm71_vm2, %v61_v26  ;;  %999 = vmatmul.mubr.msk.bf16.vlgmr.msra.gmra.mrb[12].mxu1 %vm71_vm2, %v62_v27  ;;  %v490_v26 = vsub.s32 3, %v1414_v20 }
  0x1f   :  { %1010 = vmatprep.mubr.msk.f32.mxu0 %vm1177_vm1, %v1176_v1  ;;  %1045 = vmatprep.mubr.msk.f32.mxu1 %vm1177_vm1, %v1176_v1 }
  0x20   :  { %1085 = vmatpush3.bf16.msra.mxu0 %v1084_v32  ;;  %1091 = vmatpush3.bf16.msra.mxu1 %v1090_v38  ;;  %v498_v38 = vsub.s32 5, %v1414_v20 }
  0x21   :  { %1086 = vmatprep.subr.bf16.mxu0 %v1179_v31  ;;  %1092 = vmatprep.subr.bf16.mxu1 %v1179_v31 }
  0x24   :  { %1088 = vmatpush3.bf16.msra.mxu0 %v1087_v34  ;;  %1094 = vmatpush3.bf16.msra.mxu1 %v1093_v40  ;;  %v482_v34 = vsub.s32 1, %v1414_v20 }
  0x25   :  { %1113 = vmatprep.subr.bf16.mxu0 %v1179_v31  ;;  %1095 = vmatprep.subr.bf16.mxu1 %v1179_v31 }
  0x28   :  { %1097 = vmatpush3.bf16.msra.mxu1 %v1096_v43 }
  0x29   :  { %1098 = vmatprep.subr.bf16.mxu1 %v1179_v31 }
  0x2c   :  { %1100 = vmatpush3.bf16.msra.mxu1 %v1099_v46 }
  0x2d   :  { %1101 = vmatprep.subr.bf16.mxu1 %v1179_v31 }
  0x30   :  { %1103 = vmatpush3.bf16.msra.mxu1 %v1102_v49 }
  0x31   :  { %1104 = vmatprep.subr.bf16.mxu1 %v1179_v31 }
  0x34   :  { %1106 = vmatpush3.bf16.msra.mxu1 %v1105_v52 }
  0x35   :  { %1107 = vmatprep.subr.bf16.mxu1 %v1179_v31 }
  0x38   :  { %1109 = vmatpush3.bf16.msra.mxu1 %v1108_v55 }
  0x39   :  { %1110 = vmatprep.subr.bf16.mxu1 %v1179_v31 }
  0x91   :  { %v475_v37 = vpop.permute.xlu0 %474 }
  0x92   :  { %v487_v39 = vrot.slane %v475_v37, %v486_v25  ;;  %v491_v40 = vrot.slane %v475_v37, %v490_v26  ;;  %v479_v46 = vrot.slane %v475_v37, %v478_v33  ;;  %v483_v47 = vrot.slane %v475_v37, %v482_v34 }
  0x93   :  { %v495_v51 = vrot.slane %v475_v37, %v494_v36  ;;  %v499_v55 = vrot.slane %v475_v37, %v498_v38 }
  0xd9   :  { %v113_v58 = vpop.f32.mrb[0].mxu0  ;;  %v159_v60 = vpop.f32.mrb[0].mxu1 }
  0xda   :  { %v441_v59 = vadd.f32 %v113_v58, %v63_v56  ;;  %v958_v61 = vpop.f32.mrb[1].mxu0  ;;  %v442_v62 = vadd.f32 %v159_v60, %v64_v57  ;;  %v964_v63 = vpop.f32.mrb[1].mxu1 }
  0xdb   :  { %v116_v0 = vpop.f32.mrb[2].mxu0  ;;  %v162_v2 = vpop.f32.mrb[2].mxu1 }
  0xdc   :  { %450 = vst.msk [vmem:[#allocation2] sm:$0x1] %vm38_vm3, %v441_v59  ;;  %v959_v3 = vpop.f32.mrb[3].mxu0  ;;  %451 = vst.msk [vmem:[#allocation2 + $0x1] sm:$0x1] %vm38_vm3, %v442_v62  ;;  %v965_v4 = vpop.f32.mrb[3].mxu1 }
  0xdd   :  { %v506_v2 = vsub.s32 7, %v1414_v20 }
  0xe1   :  { %v205_v7 = vpop.f32.mrb[4].mxu0  ;;  %v251_v9 = vpop.f32.mrb[4].mxu1 }
  0xe2   :  { %v443_v8 = vadd.f32 %v205_v7, %v65_v5  ;;  %v970_v10 = vpop.f32.mrb[5].mxu0  ;;  %v444_v11 = vadd.f32 %v251_v9, %v66_v6  ;;  %v976_v12 = vpop.f32.mrb[5].mxu1  ;;  %v1180_v6 = vmov 1966171168  }
  0xe3   :  { %v208_v13 = vpop.f32.mrb[6].mxu0  ;;  %v254_v14 = vpop.f32.mrb[6].mxu1  ;;  %v461_v49 = vld [vmem:[#allocation2] sm:$0x1]  ;;  %v462_v50 = vld [vmem:[#allocation2 + $0x1] sm:$0x1]  ;;  %v556_v7 = vunpack.c.l.s4 %v1180_v6  ;;  %v503_v12 = vrot.slane %v475_v37, %v502_v45 }
  0xe4   :  { %452 = vst.msk [vmem:[#allocation2 + $0x2] sm:$0x1] %vm38_vm3, %v443_v8  ;;  %v971_v15 = vpop.f32.mrb[7].mxu0  ;;  %453 = vst.msk [vmem:[#allocation2 + $0x3] sm:$0x1] %vm38_vm3, %v444_v11  ;;  %v977_v17 = vpop.f32.mrb[7].mxu1  ;;  %v516_v3 = vmul.f32 %v479_v46, %v461_v49  ;;  %v517_v4 = vmul.f32 %v483_v47, %v462_v50  ;;  %v507_v13 = vrot.slane %v475_v37, %v506_v2 }
  0xe5   :  { %v557_v16 = vunpack.c.0.s8 %v556_v7  ;;  %v771_v46 = vld [vmem:[%s1520_s7 + $0x18] sm:$0xff]  ;;  %v773_v49 = vld [vmem:[%s1520_s7 + $0x28] sm:$0xff] }
  0xe6   :  { %v524_v14 = vmax.f32 %v516_v3, 0.0  ;;  %v525_v15 = vmax.f32 %v517_v4, 0.0  ;;  %v783_v6 = vld [vmem:[%s1520_s7 + $0x78] sm:$0xff] }
  0xe7   :  { %v560_v26 = vsub.s32 %v557_v16, %v1414_v20  ;;  %v688_v20 = vld [vmem:[%s1518_s5 + $0x70] sm:$0xff] }
  0xe8   :  { %v551_v25 = vcombine.low %v524_v14, %v525_v15 }
  0xe9   :  { %v297_v21 = vpop.f32.mrb[8].mxu0  ;;  %v343_v23 = vpop.f32.mrb[8].mxu1 }
  0xea   :  { %v445_v22 = vadd.f32 %v297_v21, %v67_v18  ;;  %v982_v24 = vpop.f32.mrb[9].mxu0  ;;  %v446_v27 = vadd.f32 %v343_v23, %v68_v19  ;;  %v988_v28 = vpop.f32.mrb[9].mxu1  ;;  %v561_v33 = vrot.slane %v551_v25, %v560_v26 }
  0xeb   :  { %v300_v29 = vpop.f32.mrb[10].mxu0  ;;  %v346_v30 = vpop.f32.mrb[10].mxu1  ;;  %v463_v42 = vld [vmem:[#allocation2 + $0x2] sm:$0x1]  ;;  %v464_v43 = vld [vmem:[#allocation2 + $0x3] sm:$0x1] }
  0xec   :  { %454 = vst.msk [vmem:[#allocation2 + $0x4] sm:$0x1] %vm38_vm3, %v445_v22  ;;  %v983_v32 = vpop.f32.mrb[11].mxu0  ;;  %455 = vst.msk [vmem:[#allocation2 + $0x5] sm:$0x1] %vm38_vm3, %v446_v27  ;;  %v989_v35 = vpop.f32.mrb[11].mxu1  ;;  %v518_v56 = vmul.f32 %v487_v39, %v463_v42  ;;  %v519_v57 = vmul.f32 %v491_v40, %v464_v43 }
  0xed   :  { %v768_v43 = vld [vmem:[%s1520_s7] sm:$0xff] }
  0xee   :  { %v526_v10 = vmax.f32 %v518_v56, 0.0  ;;  %v527_v11 = vmax.f32 %v519_v57, 0.0  ;;  %v778_v57 = vld [vmem:[%s1520_s7 + $0x50] sm:$0xff] }
  0xf0   :  { %v552_v21 = vcombine.low %v526_v10, %v527_v11 }
  0xf1   :  { %v389_v48 = vpop.f32.mrb[12].mxu0  ;;  %v435_v53 = vpop.f32.mrb[12].mxu1 }
  0xf2   :  { %v447_v52 = vadd.f32 %v389_v48, %v69_v41  ;;  %v994_v54 = vpop.f32.mrb[13].mxu0  ;;  %v448_v58 = vadd.f32 %v435_v53, %v70_v44  ;;  %v1000_v59 = vpop.f32.mrb[13].mxu1  ;;  %v568_v30 = vrot.slane %v552_v21, %v560_v26  ;;  %v689_v41 = vld [vmem:[%s1518_s5 + $0x78] sm:$0xff]  ;;  %v769_v44 = vld [vmem:[%s1520_s7 + $0x8] sm:$0xff]  ;;  %v772_v48 = vld [vmem:[%s1520_s7 + $0x20] sm:$0xff] }
  0xf3   :  { %v392_v60 = vpop.f32.mrb[14].mxu0  ;;  %v438_v61 = vpop.f32.mrb[14].mxu1  ;;  %v465_v63 = vld [vmem:[#allocation2 + $0x4] sm:$0x1]  ;;  %v466_v0 = vld [vmem:[#allocation2 + $0x5] sm:$0x1]  ;;  %v1111_v42 = vpack.c.bf16 %v689_v41, %v688_v20  ;;  %v1114_v45 = vpack.c.bf16 %v769_v44, %v768_v43  ;;  %v1120_v50 = vpack.c.bf16 %v773_v49, %v772_v48 }
  0xf4   :  { %456 = vst.msk [vmem:[#allocation2 + $0x6] sm:$0x1] %vm38_vm3, %v447_v52  ;;  %v995_v62 = vpop.f32.mrb[15].mxu0  ;;  %457 = vst.msk [vmem:[#allocation2 + $0x7] sm:$0x1] %vm38_vm3, %v448_v58  ;;  %v1001_v5 = vpop.f32.mrb[15].mxu1  ;;  %v520_v8 = vmul.f32 %v495_v51, %v465_v63  ;;  %v521_v9 = vmul.f32 %v499_v55, %v466_v0  ;;  %v583_v36 = vcombine.low %v561_v33, %v568_v30 }
  0xf5   :  { %1112 = vmatpush3.bf16.msra.mxu1 %v1111_v42  ;;  %v774_v51 = vld [vmem:[%s1520_s7 + $0x30] sm:$0xff]  ;;  %v775_v52 = vld [vmem:[%s1520_s7 + $0x38] sm:$0xff]  ;;  %v776_v54 = vld [vmem:[%s1520_s7 + $0x40] sm:$0xff] }
  0xf6   :  { %v528_v18 = vmax.f32 %v520_v8, 0.0  ;;  %v529_v19 = vmax.f32 %v521_v9, 0.0  ;;  %v591_v38 = vrot.slane %v583_v36, %v560_v26  ;;  %v1123_v53 = vpack.c.bf16 %v775_v52, %v774_v51  ;;  %v777_v55 = vld [vmem:[%s1520_s7 + $0x48] sm:$0xff]  ;;  %v779_v58 = vld [vmem:[%s1520_s7 + $0x58] sm:$0xff]  ;;  %v780_v60 = vld [vmem:[%s1520_s7 + $0x60] sm:$0xff] }
  0xf7   :  { %v1126_v56 = vpack.c.bf16 %v777_v55, %v776_v54  ;;  %v1129_v59 = vpack.c.bf16 %v779_v58, %v778_v57  ;;  %v781_v61 = vld [vmem:[%s1520_s7 + $0x68] sm:$0xff]  ;;  %v895_v63 = vld [vmem:[%s1517_s4] ss:$0 sm:$0xff]  ;;  %v782_v5 = vld [vmem:[%s1520_s7 + $0x70] sm:$0xff] }
  0xf8   :  { %v553_v29 = vcombine.low %v528_v18, %v529_v19  ;;  %v1132_v62 = vpack.c.bf16 %v781_v61, %v780_v60  ;;  %v1135_v7 = vpack.c.bf16 %v783_v6, %v782_v5 }
  0xfa   :  { %v575_v34 = vrot.slane %v553_v29, %v560_v26 }
  0xfb   :  { %v467_v17 = vld [vmem:[#allocation2 + $0x6] sm:$0x1]  ;;  %v468_v22 = vld [vmem:[#allocation2 + $0x7] sm:$0x1] }
  0xfc   :  { %v522_v23 = vmul.f32 %v503_v12, %v467_v17  ;;  %v523_v24 = vmul.f32 %v507_v13, %v468_v22  ;;  %v898_v12 = vld [vmem:[%s1521_s8] ss:$0 sm:$0xff] }
  0xfe   :  { %v530_v27 = vmax.f32 %v522_v23, 0.0  ;;  %v531_v28 = vmax.f32 %v523_v24, 0.0 }
 0x100   :  { %v554_v32 = vcombine.low %v530_v27, %v531_v28 }
 0x102   :  { %v582_v35 = vrot.slane %v554_v32, %v560_v26 }
 0x104   :  { %v584_v37 = vcombine.low %v575_v34, %v582_v35 }
 0x106   :  { %v598_v39 = vrot.slane %v584_v37, %v560_v26 }
 0x108   :  { %v599_v40 = vcombine.low %v591_v38, %v598_v39 }
 0x10a   :  { %1011 = vmatmul.mubr.msk.f32.vlgmr.msra.gmra.mrb[16].mxu0 %vm600_vm4, %v599_v40 }
 0x10b   :  { %1080 = vmatprep.mubr.msk.f32.mxu0 %vm1177_vm1, %v1176_v1  ;;  %v770_v1 = vld [vmem:[%s1520_s7 + $0x10] sm:$0xff]  ;;  %1115 = vmatpush3.bf16.msra.mxu0 %v1114_v45 }
 0x10c   :  { %v1117_v47 = vpack.c.bf16 %v771_v46, %v770_v1  ;;  %1116 = vmatprep.subr.bf16.mxu0 %v1179_v31 }
 0x10f   :  { %1118 = vmatpush3.bf16.msra.mxu0 %v1117_v47 }
 0x110   :  { %1119 = vmatprep.subr.bf16.mxu0 %v1179_v31 }
 0x113   :  { %1121 = vmatpush3.bf16.msra.mxu0 %v1120_v50 }
 0x114   :  { %1122 = vmatprep.subr.bf16.mxu0 %v1179_v31 }
 0x117   :  { %1124 = vmatpush3.bf16.msra.mxu0 %v1123_v53 }
 0x118   :  { %1125 = vmatprep.subr.bf16.mxu0 %v1179_v31 }
 0x11b   :  { %1127 = vmatpush3.bf16.msra.mxu0 %v1126_v56 }
 0x11c   :  { %1128 = vmatprep.subr.bf16.mxu0 %v1179_v31 }
 0x11f   :  { %1130 = vmatpush3.bf16.msra.mxu0 %v1129_v59 }
 0x120   :  { %1131 = vmatprep.subr.bf16.mxu0 %v1179_v31 }
 0x123   :  { %1133 = vmatpush3.bf16.msra.mxu0 %v1132_v62 }
 0x124   :  { %1134 = vmatprep.subr.bf16.mxu0 %v1179_v31  ;;  %v897_v31 = vld [vmem:[%s1519_s6] ss:$0 sm:$0xff] }
 0x127   :  { %1136 = vmatpush3.bf16.msra.mxu0 %v1135_v7 }
 0x1dd   :  { %v669_v0 = vpop.f32.mrb[16].mxu0 }
 0x1de   :  { %v670_v2 = vadd.f32 %v895_v63, %v669_v0  ;;  %v1012_v3 = vpop.f32.mrb[17].mxu0 }
 0x1e0   :  { %v673_v4 = vmax.f32 %v670_v2, 0.0 }
 0x1e2   :  { %1046 = vmatmul.mubr.f32.vlgmr.msra.gmra.mrb[16].mxu1 %v673_v4 }
 0x2b5   :  { %v763_v8 = vpop.f32.mrb[16].mxu1 }
 0x2b6   :  { %v764_v9 = vadd.f32 %v897_v31, %v763_v8  ;;  %v1047_v10 = vpop.f32.mrb[17].mxu1 }
 0x2b8   :  { %v767_v11 = vmax.f32 %v764_v9, 0.0 }
 0x2ba   :  { %1081 = vmatmul.mubr.f32.vlgmr.msra.gmra.mrb[18].mxu0 %v767_v11 }
 0x38d   :  { %v857_v13 = vpop.f32.mrb[18].mxu0 }
 0x38e   :  { %v858_v14 = vadd.f32 %v898_v12, %v857_v13  ;;  %v1082_v15 = vpop.f32.mrb[19].mxu0 }
 0x390   :  { %861 = vmax.xlane.f32.xlu0 %v858_v14 }
 0x41d   :  { %v862_v16 = vpop.xlane.xlu0 %861 }
 0x41e   :  { %v863_v17 = vsub.f32 %v858_v14, %v862_v16 }
 0x420   :  { %v864_v18 = vmul.f32 1.442695, %v863_v17 }
 0x422   :  { %1148 = vpow2.f32 %v864_v18 }
 0x42c   :  { %v1149_v19 = vpop.eup %1148 }
 0x42d   :  { %866 = vadd.xlane.f32.xlu1 %v1149_v19 }
 0x4ba   :  { %v867_v21 = vpop.xlane.xlu1 %866 }
 0x4bb   :  { %1150 = vrcp.f32 %v867_v21 }
 0x4c5   :  { %v1151_v22 = vpop.eup %1150 }
 0x4c6   :  { %v869_v23 = vmul.f32 %v1151_v22, %v1149_v19 }
 0x4c8   :  { %870 = vst [vmem:[#allocation3] sm:$0xff] %v869_v23 }
 0x4c9   :  { %875 = vsyncadd [#allocation4], 64  ;;  %s1181_s6 = smov [#allocation3]  }
 0x4ca   :  { %s876_s7 = sshll.u32 %s1181_s6, 4  ;;  %s877_s7 = int_to_ptr.vmem [resolvable:$true] %s876_s7 }
 0x4cb   :  { %s1152_s8 = scalar_lea.vmem %s877_s7, 64  ;;  %s1156_s20 = scalar_lea.vmem %s877_s7, 128 }
 0x4cc   :  { %p1153_p0 = scmp.ne.s32.totalorder %s877_s7, %s1152_s8  ;;  %p1157_p1 = scmp.lt.s32.totalorder %s877_s7, %s877_s7 }
 0x4cd   :  { %p1158_p2 = scmp.lt.s32.totalorder %s1156_s20, %s1152_s8 }
 0x4cf   :  { %p1159_p3 = por %p1158_p2, %p1157_p1 }
 0x4d1   :  { %p1160_p4 = pnand %p1159_p3, %p1153_p0 }
 0x4d3   :  { %1163 = shalt.err (!%p1160_p4)
}
 0x4d4   :  { %s1164_s2 = scalar_lea.hbm %s1522_s9, 64 }
 0x4d5   :  { %p1165_p5 = scmp.ne.s32.totalorder %s1522_s9, %s1164_s2  ;;  %p1168_p6 = scmp.lt.u32.totalorder %s1164_s2, %s1522_s9 }
 0x4d7   :  { %p1170_p7 = pnand %p1168_p6, %p1165_p5 }
 0x4d9   :  { %1173 = shalt.err (!%p1170_p7)
}
 0x4da   :  { %s1182_s26 = smov 64   ;;  %s1183_s27 = smov 4  }
 0x4db   :  { %882 = dma.vmem_to_hbm [thread:$0]  %s877_s7, 64, %s1522_s9, [#allocation4], %s1182_s26, %s1182_s26, %s1183_s27  }
 0x4dc   :  { %1174 = dma.done.wait [#allocation4], 128  }
 0x4dd   :  { %1175 = vsyncadd [#allocation4], 4294967168 }
 0x4de   :  { %886 = vsyncpa [#allocation4], 1 }

</bundles_post_ra>
